<compile_context>
chip_gen: v7x
topology: tpu7x:2x2x1
jax: 0.10.0
libtpu: 0.0.40
codegen_flags: <defaults>
</compile_context>

<pallas_src>
import jax
import jax.numpy as jnp
from jax import lax
from jax.experimental import pallas as pl
from jax.experimental.pallas import tpu as pltpu


def spatial_attention_kernel(w_ref, b_ref, x_ref, o_ref, pad_avg_ref, pad_max_ref):
    # w_ref:   SMEM (18,) f32  -- conv weight (1, 2, 3, 3) flattened
    # b_ref:   SMEM (1,)  f32  -- conv bias
    # x_ref:   VMEM (C, H, W)  -- one batch element (batch dim squeezed away)
    # o_ref:   VMEM (C, H, W)
    # pad_*:   VMEM (H+2, W+2) f32 zero-bordered feature maps (avg / max)
    C, H, W = x_ref.shape

    # --- channel reduce (mean & max over C), streamed one (H, W) tile at a time ---
    x0 = x_ref[0].astype(jnp.float32)

    def reduce_body(c, carry):
        s, m = carry
        xc = x_ref[c].astype(jnp.float32)
        return s + xc, jnp.maximum(m, xc)

    s, mx = lax.fori_loop(1, C, reduce_body, (x0, x0), unroll=True)
    avg = s * jnp.float32(1.0 / C)

    # --- write zero-bordered feature maps; the border IS the conv zero padding.
    # Zero every step: on v7x the "parallel" grid may be sharded across both
    # TensorCores, so a program_id(0)==0-only init could miss one core's scratch.
    pad_avg_ref[...] = jnp.zeros_like(pad_avg_ref)
    pad_max_ref[...] = jnp.zeros_like(pad_max_ref)
    pad_avg_ref[1:H + 1, 1:W + 1] = avg
    pad_max_ref[1:H + 1, 1:W + 1] = mx

    # --- 3x3 conv, 2 in-channels -> 1 out-channel, as 18 static-slice MACs.
    # Four accumulators (2 per input-feature path) break the serial add chain.
    accs = [
        jnp.full((H, W), b_ref[0], dtype=jnp.float32),  # bias folded into acc 0
        jnp.zeros((H, W), jnp.float32),
        jnp.zeros((H, W), jnp.float32),
        jnp.zeros((H, W), jnp.float32),
    ]
    tap = 0
    for ci, pad_ref in enumerate((pad_avg_ref, pad_max_ref)):
        for ki in range(3):
            for kj in range(3):
                w = w_ref[ci * 9 + ki * 3 + kj]
                slot = 2 * ci + (tap & 1)
                accs[slot] = accs[slot] + w * pad_ref[ki:ki + H, kj:kj + W]
                tap += 1
    att = jax.nn.sigmoid((accs[0] + accs[1]) + (accs[2] + accs[3]))   # (H, W)

    # --- apply attention: per-channel streamed multiply + store ---
    def apply_body(c, carry):
        o_ref[c] = (x_ref[c] * att).astype(o_ref.dtype)
        return carry

    lax.fori_loop(0, C, apply_body, 0, unroll=True)


def spatial_attention(x, weight, bias):
    """x: (N, C, H, W); weight: (1, 2, 3, 3); bias: (1,).

    Returns x * sigmoid(conv3x3([mean_c(x), max_c(x)])), matching the PyTorch
    SpatialAttention.forward default path.
    """
    N, C, H, W = x.shape
    w_flat = weight.reshape(-1).astype(jnp.float32)   # (18,)
    b = bias.reshape(-1).astype(jnp.float32)          # (1,)

    # VMEM budget: the (C, H, W) input and output blocks are each double-buffered
    # by the Pallas pipeline, plus the two small padded scratch maps.
    block_bytes = C * H * W * x.dtype.itemsize
    scratch_bytes = 2 * (H + 2) * (W + 2) * 4
    vmem_limit = 4 * block_bytes + scratch_bytes + (2 << 20)
    vmem_limit = int(min(max(vmem_limit, 8 << 20), 48 << 20))
    # TODO(synk): for large C*H*W (v7x has only 64 MiB VMEM) tile the H axis with
    # a 1-row conv halo and add it as a second "parallel" grid axis for pipeline
    # depth / megacore; also note lane utilization is W/128, so production shapes
    # want W >= 128 (or W folded onto the lane axis in the wrapper).

    return pl.pallas_call(
        spatial_attention_kernel,
        out_shape=jax.ShapeDtypeStruct((N, C, H, W), x.dtype),
        grid=(N,),
        in_specs=[
            pl.BlockSpec(memory_space=pltpu.SMEM),                           # conv weight (scalars)
            pl.BlockSpec(memory_space=pltpu.SMEM),                           # conv bias
            pl.BlockSpec((pl.Squeezed(), C, H, W), lambda n: (n, 0, 0, 0)),  # x
        ],
        out_specs=pl.BlockSpec((pl.Squeezed(), C, H, W), lambda n: (n, 0, 0, 0)),
        scratch_shapes=[
            pltpu.VMEM((H + 2, W + 2), jnp.float32),   # zero-bordered avg features
            pltpu.VMEM((H + 2, W + 2), jnp.float32),   # zero-bordered max features
        ],
        compiler_params=pltpu.CompilerParams(
            dimension_semantics=("parallel",),
            vmem_limit_bytes=vmem_limit,
        ),
    )(w_flat, b, x)


def spatial_attention_ref(x, weight, bias):
    """Pure-JAX reference matching the PyTorch forward."""
    avg = jnp.mean(x, axis=1, keepdims=True)
    mx = jnp.max(x, axis=1, keepdims=True)
    cat = jnp.concatenate([avg, mx], axis=1)
    conv = lax.conv_general_dilated(
        cat, weight, window_strides=(1, 1), padding="SAME",
        dimension_numbers=("NCHW", "OIHW", "NCHW"))
    att = jax.nn.sigmoid(conv + bias.reshape(1, 1, 1, 1))
    return x * att


if __name__ == "__main__":
    key = jax.random.PRNGKey(0)
    kx, kw, kb = jax.random.split(key, 3)

    N, C, H, W = 2, 4, 16, 16
    x = jax.random.normal(kx, (N, C, H, W), dtype=jnp.float32)
    # Deterministic synthetic parameters (shapes from nn.Conv2d(2, 1, 3, padding=1)).
    weight = jax.random.normal(kw, (1, 2, 3, 3), dtype=jnp.float32) * 0.2
    bias = jax.random.normal(kb, (1,), dtype=jnp.float32) * 0.1

    out = spatial_attention(x, weight, bias)
    out = jax.block_until_ready(out)

    ref = spatial_attention_ref(x, weight, bias)
    assert out.shape == (N, C, H, W)
    assert jnp.allclose(out, ref, atol=1e-5, rtol=1e-5), \
        f"max abs err {jnp.max(jnp.abs(out - ref))}"

    print("KERNEL_OK")
</pallas_src>

<mosaic_0001>
module attributes {stable_mosaic.version = 11 : i64} {
  func.func @spatial_attention_kernel(%arg0: i32, %arg1: memref<18xf32, #tpu.memory_space<smem>>, %arg2: memref<1xf32, #tpu.memory_space<smem>>, %arg3: memref<1x4x16x16xf32, #tpu.memory_space<vmem>>, %arg4: memref<1x4x16x16xf32, #tpu.memory_space<vmem>>, %arg5: memref<18x18xf32, #tpu.memory_space<vmem>>, %arg6: memref<18x18xf32, #tpu.memory_space<vmem>>) attributes {dimension_semantics = [#tpu.dimension_semantics<parallel>], iteration_bounds = array<i64: 2>, scalar_prefetch = 0 : i64, scratch_operands = 2 : i64, tpu.core_type = #tpu.core_type<tc>, window_params = [{transform_indices = @transform_0, window_bounds = array<i64: 18>}, {transform_indices = @transform_1, window_bounds = array<i64: 1>}, {transform_indices = @transform_2, window_bounds = array<i64: 1, 4, 16, 16>}, {transform_indices = @transform_3, window_bounds = array<i64: 1, 4, 16, 16>}]} {
    %c0 = arith.constant 0 : index
    %c0_0 = arith.constant 0 : index
    %c0_1 = arith.constant 0 : index
    %c0_2 = arith.constant 0 : index
    %0 = vector.load %arg3[%c0, %c0_0, %c0_1, %c0_2] : memref<1x4x16x16xf32, #tpu.memory_space<vmem>>, vector<1x1x16x16xf32>
    %1 = vector.shape_cast %0 : vector<1x1x16x16xf32> to vector<16x16xf32>
    %c1_i32 = arith.constant 1 : i32
    %c0_3 = arith.constant 0 : index
    %2 = arith.index_cast %c1_i32 : i32 to index
    %c0_4 = arith.constant 0 : index
    %c0_5 = arith.constant 0 : index
    %3 = vector.load %arg3[%c0_3, %2, %c0_4, %c0_5] : memref<1x4x16x16xf32, #tpu.memory_space<vmem>>, vector<1x1x16x16xf32>
    %4 = vector.shape_cast %3 : vector<1x1x16x16xf32> to vector<16x16xf32>
    %5 = arith.addf %1, %4 : vector<16x16xf32>
    %6 = arith.maximumf %1, %4 : vector<16x16xf32>
    %c2_i32 = arith.constant 2 : i32
    %c0_6 = arith.constant 0 : index
    %7 = arith.index_cast %c2_i32 : i32 to index
    %c0_7 = arith.constant 0 : index
    %c0_8 = arith.constant 0 : index
    %8 = vector.load %arg3[%c0_6, %7, %c0_7, %c0_8] : memref<1x4x16x16xf32, #tpu.memory_space<vmem>>, vector<1x1x16x16xf32>
    %9 = vector.shape_cast %8 : vector<1x1x16x16xf32> to vector<16x16xf32>
    %10 = arith.addf %5, %9 : vector<16x16xf32>
    %11 = arith.maximumf %6, %9 : vector<16x16xf32>
    %c3_i32 = arith.constant 3 : i32
    %c0_9 = arith.constant 0 : index
    %12 = arith.index_cast %c3_i32 : i32 to index
    %c0_10 = arith.constant 0 : index
    %c0_11 = arith.constant 0 : index
    %13 = vector.load %arg3[%c0_9, %12, %c0_10, %c0_11] : memref<1x4x16x16xf32, #tpu.memory_space<vmem>>, vector<1x1x16x16xf32>
    %14 = vector.shape_cast %13 : vector<1x1x16x16xf32> to vector<16x16xf32>
    %15 = arith.addf %10, %14 : vector<16x16xf32>
    %16 = arith.maximumf %11, %14 : vector<16x16xf32>
    %c3_i32_12 = arith.constant 3 : i32
    %cst = arith.constant 2.500000e-01 : f32
    %17 = vector.broadcast %cst : f32 to vector<16x16xf32>
    %18 = arith.mulf %15, %17 : vector<16x16xf32>
    %cst_13 = arith.constant 0.000000e+00 : f32
    %19 = vector.broadcast %cst_13 : f32 to vector<18x18xf32>
    %c0_14 = arith.constant 0 : index
    %c0_15 = arith.constant 0 : index
    %20 = vector.load %arg5[%c0_14, %c0_15] : memref<18x18xf32, #tpu.memory_space<vmem>>, vector<18x18xf32>
    tpu.vector_store %arg5[%c0_14, %c0_15], %19 {strides = array<i32>} : memref<18x18xf32, #tpu.memory_space<vmem>>, vector<18x18xf32>,
    %cst_16 = arith.constant 0.000000e+00 : f32
    %21 = vector.broadcast %cst_16 : f32 to vector<18x18xf32>
    %c0_17 = arith.constant 0 : index
    %c0_18 = arith.constant 0 : index
    %22 = vector.load %arg6[%c0_17, %c0_18] : memref<18x18xf32, #tpu.memory_space<vmem>>, vector<18x18xf32>
    tpu.vector_store %arg6[%c0_17, %c0_18], %21 {strides = array<i32>} : memref<18x18xf32, #tpu.memory_space<vmem>>, vector<18x18xf32>,
    %c1 = arith.constant 1 : index
    %c1_19 = arith.constant 1 : index
    %23 = vector.load %arg5[%c1, %c1_19] : memref<18x18xf32, #tpu.memory_space<vmem>>, vector<16x16xf32>
    tpu.vector_store %arg5[%c1, %c1_19], %18 {strides = array<i32>} : memref<18x18xf32, #tpu.memory_space<vmem>>, vector<16x16xf32>,
    %c1_20 = arith.constant 1 : index
    %c1_21 = arith.constant 1 : index
    %24 = vector.load %arg6[%c1_20, %c1_21] : memref<18x18xf32, #tpu.memory_space<vmem>>, vector<16x16xf32>
    tpu.vector_store %arg6[%c1_20, %c1_21], %16 {strides = array<i32>} : memref<18x18xf32, #tpu.memory_space<vmem>>, vector<16x16xf32>,
    %c0_22 = arith.constant 0 : index
    %25 = memref.load %arg2[%c0_22] : memref<1xf32, #tpu.memory_space<smem>>
    %26 = vector.broadcast %25 : f32 to vector<16x16xf32>
    %cst_23 = arith.constant 0.000000e+00 : f32
    %27 = vector.broadcast %cst_23 : f32 to vector<16x16xf32>
    %cst_24 = arith.constant 0.000000e+00 : f32
    %28 = vector.broadcast %cst_24 : f32 to vector<16x16xf32>
    %cst_25 = arith.constant 0.000000e+00 : f32
    %29 = vector.broadcast %cst_25 : f32 to vector<16x16xf32>
    %c0_26 = arith.constant 0 : index
    %30 = memref.load %arg1[%c0_26] : memref<18xf32, #tpu.memory_space<smem>>
    %c0_27 = arith.constant 0 : index
    %c0_28 = arith.constant 0 : index
    %31 = vector.load %arg5[%c0_27, %c0_28] : memref<18x18xf32, #tpu.memory_space<vmem>>, vector<16x16xf32>
    %32 = vector.broadcast %30 : f32 to vector<16x16xf32>
    %33 = arith.mulf %32, %31 : vector<16x16xf32>
    %34 = arith.addf %26, %33 : vector<16x16xf32>
    %c1_29 = arith.constant 1 : index
    %35 = memref.load %arg1[%c1_29] : memref<18xf32, #tpu.memory_space<smem>>
    %c0_30 = arith.constant 0 : index
    %c1_31 = arith.constant 1 : index
    %36 = vector.load %arg5[%c0_30, %c1_31] : memref<18x18xf32, #tpu.memory_space<vmem>>, vector<16x16xf32>
    %37 = vector.broadcast %35 : f32 to vector<16x16xf32>
    %38 = arith.mulf %37, %36 : vector<16x16xf32>
    %39 = arith.addf %27, %38 : vector<16x16xf32>
    %c2 = arith.constant 2 : index
    %40 = memref.load %arg1[%c2] : memref<18xf32, #tpu.memory_space<smem>>
    %c0_32 = arith.constant 0 : index
    %c2_33 = arith.constant 2 : index
    %41 = vector.load %arg5[%c0_32, %c2_33] : memref<18x18xf32, #tpu.memory_space<vmem>>, vector<16x16xf32>
    %42 = vector.broadcast %40 : f32 to vector<16x16xf32>
    %43 = arith.mulf %42, %41 : vector<16x16xf32>
    %44 = arith.addf %34, %43 : vector<16x16xf32>
    %c3 = arith.constant 3 : index
    %45 = memref.load %arg1[%c3] : memref<18xf32, #tpu.memory_space<smem>>
    %c1_34 = arith.constant 1 : index
    %c0_35 = arith.constant 0 : index
    %46 = vector.load %arg5[%c1_34, %c0_35] : memref<18x18xf32, #tpu.memory_space<vmem>>, vector<16x16xf32>
    %47 = vector.broadcast %45 : f32 to vector<16x16xf32>
    %48 = arith.mulf %47, %46 : vector<16x16xf32>
    %49 = arith.addf %39, %48 : vector<16x16xf32>
    %c4 = arith.constant 4 : index
    %50 = memref.load %arg1[%c4] : memref<18xf32, #tpu.memory_space<smem>>
    %c1_36 = arith.constant 1 : index
    %c1_37 = arith.constant 1 : index
    %51 = vector.load %arg5[%c1_36, %c1_37] : memref<18x18xf32, #tpu.memory_space<vmem>>, vector<16x16xf32>
    %52 = vector.broadcast %50 : f32 to vector<16x16xf32>
    %53 = arith.mulf %52, %51 : vector<16x16xf32>
    %54 = arith.addf %44, %53 : vector<16x16xf32>
    %c5 = arith.constant 5 : index
    %55 = memref.load %arg1[%c5] : memref<18xf32, #tpu.memory_space<smem>>
    %c1_38 = arith.constant 1 : index
    %c2_39 = arith.constant 2 : index
    %56 = vector.load %arg5[%c1_38, %c2_39] : memref<18x18xf32, #tpu.memory_space<vmem>>, vector<16x16xf32>
    %57 = vector.broadcast %55 : f32 to vector<16x16xf32>
    %58 = arith.mulf %57, %56 : vector<16x16xf32>
    %59 = arith.addf %49, %58 : vector<16x16xf32>
    %c6 = arith.constant 6 : index
    %60 = memref.load %arg1[%c6] : memref<18xf32, #tpu.memory_space<smem>>
    %c2_40 = arith.constant 2 : index
    %c0_41 = arith.constant 0 : index
    %61 = vector.load %arg5[%c2_40, %c0_41] : memref<18x18xf32, #tpu.memory_space<vmem>>, vector<16x16xf32>
    %62 = vector.broadcast %60 : f32 to vector<16x16xf32>
    %63 = arith.mulf %62, %61 : vector<16x16xf32>
    %64 = arith.addf %54, %63 : vector<16x16xf32>
    %c7 = arith.constant 7 : index
    %65 = memref.load %arg1[%c7] : memref<18xf32, #tpu.memory_space<smem>>
    %c2_42 = arith.constant 2 : index
    %c1_43 = arith.constant 1 : index
    %66 = vector.load %arg5[%c2_42, %c1_43] : memref<18x18xf32, #tpu.memory_space<vmem>>, vector<16x16xf32>
    %67 = vector.broadcast %65 : f32 to vector<16x16xf32>
    %68 = arith.mulf %67, %66 : vector<16x16xf32>
    %69 = arith.addf %59, %68 : vector<16x16xf32>
    %c8 = arith.constant 8 : index
    %70 = memref.load %arg1[%c8] : memref<18xf32, #tpu.memory_space<smem>>
    %c2_44 = arith.constant 2 : index
    %c2_45 = arith.constant 2 : index
    %71 = vector.load %arg5[%c2_44, %c2_45] : memref<18x18xf32, #tpu.memory_space<vmem>>, vector<16x16xf32>
    %72 = vector.broadcast %70 : f32 to vector<16x16xf32>
    %73 = arith.mulf %72, %71 : vector<16x16xf32>
    %74 = arith.addf %64, %73 : vector<16x16xf32>
    %c9 = arith.constant 9 : index
    %75 = memref.load %arg1[%c9] : memref<18xf32, #tpu.memory_space<smem>>
    %c0_46 = arith.constant 0 : index
    %c0_47 = arith.constant 0 : index
    %76 = vector.load %arg6[%c0_46, %c0_47] : memref<18x18xf32, #tpu.memory_space<vmem>>, vector<16x16xf32>
    %77 = vector.broadcast %75 : f32 to vector<16x16xf32>
    %78 = arith.mulf %77, %76 : vector<16x16xf32>
    %79 = arith.addf %29, %78 : vector<16x16xf32>
    %c10 = arith.constant 10 : index
    %80 = memref.load %arg1[%c10] : memref<18xf32, #tpu.memory_space<smem>>
    %c0_48 = arith.constant 0 : index
    %c1_49 = arith.constant 1 : index
    %81 = vector.load %arg6[%c0_48, %c1_49] : memref<18x18xf32, #tpu.memory_space<vmem>>, vector<16x16xf32>
    %82 = vector.broadcast %80 : f32 to vector<16x16xf32>
    %83 = arith.mulf %82, %81 : vector<16x16xf32>
    %84 = arith.addf %28, %83 : vector<16x16xf32>
    %c11 = arith.constant 11 : index
    %85 = memref.load %arg1[%c11] : memref<18xf32, #tpu.memory_space<smem>>
    %c0_50 = arith.constant 0 : index
    %c2_51 = arith.constant 2 : index
    %86 = vector.load %arg6[%c0_50, %c2_51] : memref<18x18xf32, #tpu.memory_space<vmem>>, vector<16x16xf32>
    %87 = vector.broadcast %85 : f32 to vector<16x16xf32>
    %88 = arith.mulf %87, %86 : vector<16x16xf32>
    %89 = arith.addf %79, %88 : vector<16x16xf32>
    %c12 = arith.constant 12 : index
    %90 = memref.load %arg1[%c12] : memref<18xf32, #tpu.memory_space<smem>>
    %c1_52 = arith.constant 1 : index
    %c0_53 = arith.constant 0 : index
    %91 = vector.load %arg6[%c1_52, %c0_53] : memref<18x18xf32, #tpu.memory_space<vmem>>, vector<16x16xf32>
    %92 = vector.broadcast %90 : f32 to vector<16x16xf32>
    %93 = arith.mulf %92, %91 : vector<16x16xf32>
    %94 = arith.addf %84, %93 : vector<16x16xf32>
    %c13 = arith.constant 13 : index
    %95 = memref.load %arg1[%c13] : memref<18xf32, #tpu.memory_space<smem>>
    %c1_54 = arith.constant 1 : index
    %c1_55 = arith.constant 1 : index
    %96 = vector.load %arg6[%c1_54, %c1_55] : memref<18x18xf32, #tpu.memory_space<vmem>>, vector<16x16xf32>
    %97 = vector.broadcast %95 : f32 to vector<16x16xf32>
    %98 = arith.mulf %97, %96 : vector<16x16xf32>
    %99 = arith.addf %89, %98 : vector<16x16xf32>
    %c14 = arith.constant 14 : index
    %100 = memref.load %arg1[%c14] : memref<18xf32, #tpu.memory_space<smem>>
    %c1_56 = arith.constant 1 : index
    %c2_57 = arith.constant 2 : index
    %101 = vector.load %arg6[%c1_56, %c2_57] : memref<18x18xf32, #tpu.memory_space<vmem>>, vector<16x16xf32>
    %102 = vector.broadcast %100 : f32 to vector<16x16xf32>
    %103 = arith.mulf %102, %101 : vector<16x16xf32>
    %104 = arith.addf %94, %103 : vector<16x16xf32>
    %c15 = arith.constant 15 : index
    %105 = memref.load %arg1[%c15] : memref<18xf32, #tpu.memory_space<smem>>
    %c2_58 = arith.constant 2 : index
    %c0_59 = arith.constant 0 : index
    %106 = vector.load %arg6[%c2_58, %c0_59] : memref<18x18xf32, #tpu.memory_space<vmem>>, vector<16x16xf32>
    %107 = vector.broadcast %105 : f32 to vector<16x16xf32>
    %108 = arith.mulf %107, %106 : vector<16x16xf32>
    %109 = arith.addf %99, %108 : vector<16x16xf32>
    %c16 = arith.constant 16 : index
    %110 = memref.load %arg1[%c16] : memref<18xf32, #tpu.memory_space<smem>>
    %c2_60 = arith.constant 2 : index
    %c1_61 = arith.constant 1 : index
    %111 = vector.load %arg6[%c2_60, %c1_61] : memref<18x18xf32, #tpu.memory_space<vmem>>, vector<16x16xf32>
    %112 = vector.broadcast %110 : f32 to vector<16x16xf32>
    %113 = arith.mulf %112, %111 : vector<16x16xf32>
    %114 = arith.addf %104, %113 : vector<16x16xf32>
    %c17 = arith.constant 17 : index
    %115 = memref.load %arg1[%c17] : memref<18xf32, #tpu.memory_space<smem>>
    %c2_62 = arith.constant 2 : index
    %c2_63 = arith.constant 2 : index
    %116 = vector.load %arg6[%c2_62, %c2_63] : memref<18x18xf32, #tpu.memory_space<vmem>>, vector<16x16xf32>
    %117 = vector.broadcast %115 : f32 to vector<16x16xf32>
    %118 = arith.mulf %117, %116 : vector<16x16xf32>
    %119 = arith.addf %109, %118 : vector<16x16xf32>
    %120 = arith.addf %74, %69 : vector<16x16xf32>
    %121 = arith.addf %114, %119 : vector<16x16xf32>
    %122 = arith.addf %120, %121 : vector<16x16xf32>
    %123 = arith.negf %122 : vector<16x16xf32>
    %124 = math.exp %123 : vector<16x16xf32>
    %cst_64 = arith.constant 1.000000e+00 : f32
    %125 = vector.broadcast %cst_64 : f32 to vector<16x16xf32>
    %126 = arith.addf %125, %124 : vector<16x16xf32>
    %127 = arith.divf %125, %126 : vector<16x16xf32>
    %c0_i32 = arith.constant 0 : i32
    %c0_65 = arith.constant 0 : index
    %128 = arith.index_cast %c0_i32 : i32 to index
    %c0_66 = arith.constant 0 : index
    %c0_67 = arith.constant 0 : index
    %129 = vector.load %arg3[%c0_65, %128, %c0_66, %c0_67] : memref<1x4x16x16xf32, #tpu.memory_space<vmem>>, vector<1x1x16x16xf32>
    %130 = vector.shape_cast %129 : vector<1x1x16x16xf32> to vector<16x16xf32>
    %131 = arith.mulf %130, %127 : vector<16x16xf32>
    %c0_68 = arith.constant 0 : index
    %132 = arith.index_cast %c0_i32 : i32 to index
    %c0_69 = arith.constant 0 : index
    %c0_70 = arith.constant 0 : index
    %133 = vector.load %arg4[%c0_68, %132, %c0_69, %c0_70] : memref<1x4x16x16xf32, #tpu.memory_space<vmem>>, vector<1x1x16x16xf32>
    %134 = vector.shape_cast %133 : vector<1x1x16x16xf32> to vector<16x16xf32>
    %135 = vector.shape_cast %131 : vector<16x16xf32> to vector<1x1x16x16xf32>
    tpu.vector_store %arg4[%c0_68, %132, %c0_69, %c0_70], %135 {strides = array<i32>} : memref<1x4x16x16xf32, #tpu.memory_space<vmem>>, vector<1x1x16x16xf32>,
    %c1_i32_71 = arith.constant 1 : i32
    %c0_72 = arith.constant 0 : index
    %136 = arith.index_cast %c1_i32_71 : i32 to index
    %c0_73 = arith.constant 0 : index
    %c0_74 = arith.constant 0 : index
    %137 = vector.load %arg3[%c0_72, %136, %c0_73, %c0_74] : memref<1x4x16x16xf32, #tpu.memory_space<vmem>>, vector<1x1x16x16xf32>
    %138 = vector.shape_cast %137 : vector<1x1x16x16xf32> to vector<16x16xf32>
    %139 = arith.mulf %138, %127 : vector<16x16xf32>
    %c0_75 = arith.constant 0 : index
    %140 = arith.index_cast %c1_i32_71 : i32 to index
    %c0_76 = arith.constant 0 : index
    %c0_77 = arith.constant 0 : index
    %141 = vector.load %arg4[%c0_75, %140, %c0_76, %c0_77] : memref<1x4x16x16xf32, #tpu.memory_space<vmem>>, vector<1x1x16x16xf32>
    %142 = vector.shape_cast %141 : vector<1x1x16x16xf32> to vector<16x16xf32>
    %143 = vector.shape_cast %139 : vector<16x16xf32> to vector<1x1x16x16xf32>
    tpu.vector_store %arg4[%c0_75, %140, %c0_76, %c0_77], %143 {strides = array<i32>} : memref<1x4x16x16xf32, #tpu.memory_space<vmem>>, vector<1x1x16x16xf32>,
    %c2_i32_78 = arith.constant 2 : i32
    %c0_79 = arith.constant 0 : index
    %144 = arith.index_cast %c2_i32_78 : i32 to index
    %c0_80 = arith.constant 0 : index
    %c0_81 = arith.constant 0 : index
    %145 = vector.load %arg3[%c0_79, %144, %c0_80, %c0_81] : memref<1x4x16x16xf32, #tpu.memory_space<vmem>>, vector<1x1x16x16xf32>
    %146 = vector.shape_cast %145 : vector<1x1x16x16xf32> to vector<16x16xf32>
    %147 = arith.mulf %146, %127 : vector<16x16xf32>
    %c0_82 = arith.constant 0 : index
    %148 = arith.index_cast %c2_i32_78 : i32 to index
    %c0_83 = arith.constant 0 : index
    %c0_84 = arith.constant 0 : index
    %149 = vector.load %arg4[%c0_82, %148, %c0_83, %c0_84] : memref<1x4x16x16xf32, #tpu.memory_space<vmem>>, vector<1x1x16x16xf32>
    %150 = vector.shape_cast %149 : vector<1x1x16x16xf32> to vector<16x16xf32>
    %151 = vector.shape_cast %147 : vector<16x16xf32> to vector<1x1x16x16xf32>
    tpu.vector_store %arg4[%c0_82, %148, %c0_83, %c0_84], %151 {strides = array<i32>} : memref<1x4x16x16xf32, #tpu.memory_space<vmem>>, vector<1x1x16x16xf32>,
    %c3_i32_85 = arith.constant 3 : i32
    %c0_86 = arith.constant 0 : index
    %152 = arith.index_cast %c3_i32_85 : i32 to index
    %c0_87 = arith.constant 0 : index
    %c0_88 = arith.constant 0 : index
    %153 = vector.load %arg3[%c0_86, %152, %c0_87, %c0_88] : memref<1x4x16x16xf32, #tpu.memory_space<vmem>>, vector<1x1x16x16xf32>
    %154 = vector.shape_cast %153 : vector<1x1x16x16xf32> to vector<16x16xf32>
    %155 = arith.mulf %154, %127 : vector<16x16xf32>
    %c0_89 = arith.constant 0 : index
    %156 = arith.index_cast %c3_i32_85 : i32 to index
    %c0_90 = arith.constant 0 : index
    %c0_91 = arith.constant 0 : index
    %157 = vector.load %arg4[%c0_89, %156, %c0_90, %c0_91] : memref<1x4x16x16xf32, #tpu.memory_space<vmem>>, vector<1x1x16x16xf32>
    %158 = vector.shape_cast %157 : vector<1x1x16x16xf32> to vector<16x16xf32>
    %159 = vector.shape_cast %155 : vector<16x16xf32> to vector<1x1x16x16xf32>
    tpu.vector_store %arg4[%c0_89, %156, %c0_90, %c0_91], %159 {strides = array<i32>} : memref<1x4x16x16xf32, #tpu.memory_space<vmem>>, vector<1x1x16x16xf32>,
    %c4_i32 = arith.constant 4 : i32
    return
  }
  func.func @transform_0(%arg0: i32) -> i32 {
    %c0_i32 = arith.constant 0 : i32
    %c0_i32_0 = arith.constant 0 : i32
    return %c0_i32 : i32
  }
  func.func @transform_1(%arg0: i32) -> i32 {
    %c0_i32 = arith.constant 0 : i32
    %c0_i32_0 = arith.constant 0 : i32
    return %c0_i32 : i32
  }
  func.func @transform_2(%arg0: i32) -> (i32, i32, i32, i32) {
    %c0_i32 = arith.constant 0 : i32
    %c0_i32_0 = arith.constant 0 : i32
    %c0_i32_1 = arith.constant 0 : i32
    %c0_i32_2 = arith.constant 0 : i32
    return %arg0, %c0_i32, %c0_i32_0, %c0_i32_1 : i32, i32, i32, i32
  }
  func.func @transform_3(%arg0: i32) -> (i32, i32, i32, i32) {
    %c0_i32 = arith.constant 0 : i32
    %c0_i32_0 = arith.constant 0 : i32
    %c0_i32_1 = arith.constant 0 : i32
    %c0_i32_2 = arith.constant 0 : i32
    return %arg0, %c0_i32, %c0_i32_0, %c0_i32_1 : i32, i32, i32, i32
  }
}

</mosaic_0001>

<bundles_post_ra>
// kernel: tpu_custom_call.1
= control target key start
LH: loop header
LB: loop body
LE: loop exit
PB: predicated region body
PF: predicated region fallthrough
CT: control target
= control target key end

     0   :  { %s1235_s0 = inlined_call_operand.vmem [shape: f32[18], index: 0, kind: input, shape index: {}]   ;;  %s1236_s1 = inlined_call_operand.<no memory space> [shape: f32[1], index: 1, kind: input, shape index: {}]   ;;  %s1237_s2 = inlined_call_operand.hbm [shape: f32[2,4,16,16], index: 2, kind: input, shape index: {}]   ;;  %s1238_s3 = inlined_call_operand.hbm [shape: f32[2,4,16,16], index: 3, kind: output, shape index: {}]  }
   0x1   :  { %8 = sst [smem:[#allocation4]] %s1236_s1 }
   0x2   :  { %9 = vsyncpa [#allocation8], 0 }
   0x3   :  { %10 = vsyncpa [#allocation6], 0 }
   0x4   :  { %12 = vsyncpa [#allocation6 + $0x1], 0 }
   0x5   :  { %13 = vsyncpa [#allocation7], 0 }
   0x6   :  { %15 = vsyncpa [#allocation7 + $0x1], 0  ;;  %s908_s14 = smov 0   ;;  %s910_s15 = smov 0  }
   0x7   :  { %s912_s16 = smov 0   ;;  %s914_s17 = smov 0  }
   0x8 LB: > { %s929_s1 = sadd.s32 4294967295, %s872_s17   ;;  %s629_s18 = sadd.s32 4294967294, %s872_s17   ;;  %s872_s17 = sphi %s914_s17, %s1258_s17   ;;  %s868_s16 = sphi %s912_s16, %s1257_s16   ;;  %s864_s15 = sphi %s910_s15, %s1256_s15   ;;  %s860_s14 = sphi %s908_s14, %s1255_s14  }
   0x9   : > { %s933_s19 = sadd.s32 1, %s872_s17   ;;  %s70_s20 = sadd.s32 1, %s868_s16 }
   0xa   : > { %s67_s21 = ssub.s32 %s872_s17, %s933_s19  ;;  %p77_p0 = scmp.ne.s32.totalorder %s868_s16, %s864_s15 }
   0xb   : > { %p68_p1 = scmp.eq.s32.totalorder %s67_s21, 0  ;;  %p78_p2 = scmp.eq.s32.totalorder %s872_s17, 0 }
   0xc   : > { %p83_p3 = scmp.ne.s32.totalorder %s864_s15, %s860_s14  ;;  %p1240_p4 = scmp.eq.s32.totalorder %s929_s1, 0 }
   0xd   : > { %s945_s22 = scalar_select %p68_p1, %s868_s16, %s70_s20  }
   0xe   : > { %p947_p5 = por %p78_p2, %p77_p0  ;;  %p953_p6 = por %p1240_p4, %p83_p3 }
   0xf   : > { %p107_p7 = scmp.eq.s32.totalorder %s929_s1, 1  ;;  %p113_p8 = scmp.eq.s32.totalorder %s629_s18, 1 }
  0x10   : > { %s1243_s24 = scalar_select %p953_p6, 1, 0 }
  0x11   : > { %p630_p9 = scmp.ge.s32.totalorder %s872_s17, 1  ;;  %p120_p10 = scmp.lt.s32.totalorder %s872_s17, 3 }
  0x12   : > { %p960_p11 = por %p107_p7, %p77_p0  ;;  %p964_p12 = por %p113_p8, %p83_p3 }
  0x13   : > { %p968_p13 = pnand %p630_p9, %p120_p10  ;;  %s133_s30 = sshll.u32 %s1235_s0, 4  ;;  %s134_s30 = int_to_ptr.vmem [resolvable:$true] %s133_s30 }
  0x14   : > { %s1244_s25 = scalar_select %p960_p11, 1, 0 }
  0x15   : > { %s1245_s26 = scalar_select %p964_p12, 1, 0 }
  0x16   : > { %p692_p1 = pneg %p968_p13  ;;  %p705_p2 = scmp.lt.s32.totalorder %s872_s17, 2 }
  0x17   : > { %s147_s5 = sand.u32 1, %s868_s16   ;;  %s757_s8 = scalar_lea.vmem %s134_s30, 16 }
  0x18   : > { %p981_p7 = pnand %p692_p1, %p1240_p4  ;;  %p988_p3 = pnand %p705_p2, %p947_p5 }
  0x19   : > { %s633_s7 = sshll.u32 %s147_s5, 6  ;;  %p758_p8 = scmp.ne.s32.totalorder %s134_s30, %s757_s8 }
  0x1a   : > { %p759_p9 = pneg %p981_p7  ;;  %p765_p12 = scmp.lt.s32.totalorder %s134_s30, %s134_s30 }
  0x1b   : > { %p766_p11 = scmp.lt.s32.totalorder %s757_s8, %s757_s8 }
  0x1c   : > { %p760_p10 = pnand %p759_p9, %p758_p8 }
  0x1d   : > { %p767_p1 = por %p766_p11, %p765_p12 }
  0x1e   : > { %p761_p0 = pneg %p760_p10 }
  0x20   : > { %p768_p4 = pnand %p767_p1, %p761_p0 }
  0x22   : > { %771 = shalt.err (!%p768_p4)
}
  0x23   : > { %s874_s9 = smov [#allocation5]   ;;  %s682_s10 = sshll.u32 %s872_s17, 10 }
  0x24   : > { %695 = dma.vmem_to_smem (!%p981_p7), %s134_s30, 16, %s874_s9, [#allocation8]  }
  0x25   : > { %s151_s11 = scalar_lea.vmem [#allocation9], %s633_s7  ;;  %s1000_s20 = scalar_lea.hbm %s1237_s2, %s682_s10 }
  0x26   : > { %s158_s12 = sshll.u32 %s151_s11, 4  ;;  %s1004_s21 = scalar_lea.sflag [#allocation6], %s147_s5  ;;  %s1002_s12 = int_to_ptr.vmem [resolvable:$true] %s158_s12 }
  0x27   : > { %s772_s23 = scalar_lea.hbm %s1000_s20, 1024  ;;  %p774_p5 = pneg %p988_p3 }
  0x28   : > { %p773_p4 = scmp.ne.s32.totalorder %s1000_s20, %s772_s23  ;;  %s777_s30 = scalar_lea.hbm %s1237_s2, 2048 }
  0x29   : > { %p778_p0 = scmp.lt.u32.totalorder %s1000_s20, %s1237_s2  ;;  %p779_p2 = scmp.lt.u32.totalorder %s777_s30, %s772_s23 }
  0x2a   : > { %p775_p11 = pnand %p774_p5, %p773_p4  ;;  %p781_p8 = scmp.lt.u32.totalorder %s772_s23, %s1000_s20 }
  0x2b   : > { %p780_p7 = por %p779_p2, %p778_p0 }
  0x2c   : > { %p776_p12 = pneg %p775_p11 }
  0x2d   : > { %p782_p9 = por %p781_p8, %p780_p7 }
  0x2f   : > { %p783_p10 = pnand %p782_p9, %p776_p12 }
  0x31   : > { %786 = shalt.err (!%p783_p10)
}
  0x32   : > { %s787_s5 = scalar_lea.vmem %s1002_s12, 1024  ;;  %s875_s8 = smov [#allocation9]  }
  0x33   : > { %p788_p1 = scmp.ne.s32.totalorder %s1002_s12, %s787_s5  ;;  %s792_s9 = sshll.u32 %s875_s8, 4  ;;  %s793_s9 = int_to_ptr.vmem [resolvable:$false] %s792_s9 }
  0x34   : > { %s794_s10 = scalar_lea.vmem %s793_s9, 2048  ;;  %p795_p6 = scmp.lt.s32.totalorder %s1002_s12, %s793_s9 }
  0x35   : > { %p790_p4 = pnand %p788_p1, %p774_p5  ;;  %p796_p0 = scmp.lt.s32.totalorder %s794_s10, %s787_s5 }
  0x37   : > { %p791_p11 = pneg %p790_p4  ;;  %p797_p2 = por %p796_p0, %p795_p6 }
  0x39   : > { %p798_p7 = pnand %p797_p2, %p791_p11 }
  0x3b   : > { %801 = shalt.err (!%p798_p7)
}
  0x3c   : > { %s876_s11 = smov 128   ;;  %s877_s13 = smov 8  }
  0x3d   : > { %699 = dma.hbm_to_vmem [thread:$0]  (!%p988_p3), %s1000_s20, 1024, %s1002_s12, %s1004_s21, %s876_s11, %s876_s11, %s877_s13  }
  0x3e   : > { %170 = sbr.rel (%p968_p13) target bundleno = 615 (0x267), region = 32  ;;  %p1249_p5 = scmp.eq.s32.totalorder (!%p968_p13), %s929_s1, 0 }
  0x45   : > { %847 = dma.done.wait (%p1249_p5), [#allocation8], 16   ;;  %p1250_p12 = pmov %p1249_p5 }
  0x46   : > { %s1039_s18 = sand.u32 1, %s864_s15   ;;  %p1251_p6 = scmp.ne.s32.totalorder %s1243_s24, 0 }
  0x47   : > { %849 = vsyncadd (%p1250_p12), [#allocation8], 4294967280  ;;  %s638_s23 = sshll.u32 %s1039_s18, 6  ;;  %s177_s28 = scalar_lea.sflag [#allocation6], %s1039_s18 }
  0x48   : > { %s180_s6 = scalar_lea.vmem [#allocation9], %s638_s23 }
  0x49   : > { %851 = dma.done.wait (%p1251_p6), %s177_s28, 1024  }
  0x4a   : > { %853 = vsyncadd (%p1251_p6), %s177_s28, 4294966272 }
  0x4b   : > { %185 = sfence }
  0x4c   : > { %v1049_v0 = vld [vmem:[%s180_s6] sm:$0xff]  ;;  %v1051_v1 = vld [vmem:[%s180_s6 + $0x10] sm:$0xff]  ;;  %vm229_vm0 = vcmask 146432   ;;  %v1057_v4 = vld [vmem:[%s180_s6 + $0x8] sm:$0xff]  ;;  %v878_v7 = vmov 0.0   ;;  %vm232_vm1 = vcmask 140288  }
  0x4d   : > { %v1053_v2 = vld [vmem:[%s180_s6 + $0x20] sm:$0xff]  ;;  %v211_v3 = vmax.f32 %v1049_v0, %v1051_v1  ;;  %v1059_v5 = vld [vmem:[%s180_s6 + $0x18] sm:$0xff]  ;;  %v209_v6 = vadd.f32 %v1051_v1, %v1049_v0  ;;  %234 = vst.msk [vmem:[#allocation3] sm:$0xff] %vm229_vm0, %v878_v7  ;;  %235 = vst.msk [vmem:[#allocation3 + $0x8] sm:$0xff] %vm229_vm0, %v878_v7  ;;  %s879_s24 = smov 1   ;;  %vm245_vm2 = vcmask 138248  }
  0x4e   : > { %230 = vst.msk [vmem:[#allocation2] sm:$0xff] %vm229_vm0, %v878_v7  ;;  %231 = vst.msk [vmem:[#allocation2 + $0x8] sm:$0xff] %vm229_vm0, %v878_v7  ;;  %v1063_v8 = vld [vmem:[%s180_s6 + $0x30] sm:$0xff]  ;;  %v212_v9 = vmax.f32 %v1057_v4, %v1059_v5  ;;  %v1067_v10 = vld [vmem:[%s180_s6 + $0x28] sm:$0xff]  ;;  %v210_v11 = vadd.f32 %v1059_v5, %v1057_v4  ;;  %s656_s27 = sld [smem:[#allocation5 + $0xb]]  ;;  %s658_s12 = sld [smem:[#allocation5 + $0xd]] }
  0x4f   : > { %236 = vst.msk [vmem:[#allocation3 + $0x10] sm:$0x3] %vm232_vm1, %v878_v7  ;;  %233 = vst.msk [vmem:[#allocation2 + $0x10] sm:$0x3] %vm232_vm1, %v878_v7  ;;  %v218_v12 = vmax.f32 %v211_v3, %v1053_v2  ;;  %v216_v13 = vadd.f32 %v1053_v2, %v209_v6  ;;  %v1074_v15 = vld [vmem:[%s180_s6 + $0x38] sm:$0xff]  ;;  %s662_s20 = sld [smem:[#allocation5 + $0x11]] }
  0x50   : > { %v219_v14 = vmax.f32 %v212_v9, %v1067_v10  ;;  %v217_v16 = vadd.f32 %v1067_v10, %v210_v11  ;;  %s657_s21 = sld [smem:[#allocation5 + $0xc]]  ;;  %s880_s29 = smov 126   ;;  %vm506_vm3 = vcmask 130048  }
  0x51   : > { %v225_v17 = vmax.f32 %v218_v12, %v1063_v8  ;;  %v223_v18 = vadd.f32 %v1063_v8, %v216_v13  ;;  %s659_s30 = sld [smem:[#allocation5 + $0xe]]  ;;  %s881_s4 = smov 127  }
  0x52   : > { %v224_v19 = vadd.f32 %v1074_v15, %v217_v16  ;;  %v226_v20 = vmax.f32 %v219_v14, %v1074_v15  ;;  %s648_s7 = sld [smem:[#allocation5 + $0x3]]  ;;  %s650_s5 = sld [smem:[#allocation5 + $0x5]] }
  0x53   : > { %250 = vrot.lane.b32.xlu0 %v225_v17, %s879_s24  ;;  %v227_v21 = vmul.f32 0.25, %v223_v18  ;;  %s654_s8 = sld [smem:[#allocation5 + $0x9]]  ;;  %s660_s9 = sld [smem:[#allocation5 + $0xf]] }
  0x54   : > { %v228_v22 = vmul.f32 0.25, %v224_v19  ;;  %v375_v26 = vstv %s656_s27  ;;  %v405_v31 = vstv %s658_s12  ;;  %s1119_s10 = sld [smem:[#allocation5 + $0xa]]  ;;  %s1126_s13 = sld [smem:[#allocation5 + $0x4]] }
  0x55   : > { %239 = vrot.lane.b32.xlu1 %v227_v21, %s879_s24  ;;  %v447_v36 = vstv %s662_s20  ;;  %s1122_s11 = sld [smem:[#allocation5 + $0x2]]  ;;  %s1128_s28 = sld [smem:[#allocation5 + $0x10]] }
  0x56   : > { %v391_v40 = vstv %s657_s21  ;;  %s1131_s6 = sld [smem:[#allocation5 + $0x1]]  ;;  %s1137_s27 = sld [smem:[#allocation5 + $0x8]] }
  0x57   : > { %252 = vrot.lane.b32.xlu0 %v226_v20, %s879_s24  ;;  %v419_v44 = vstv %s659_s30  ;;  %s1143_s12 = sld [smem:[#allocation5 + $0x7]]  ;;  %s258_s20 = sld [smem:[#allocation4]] }
  0x58   : > { %v291_v46 = vstv %s648_s7  ;;  %v319_v50 = vstv %s650_s5  ;;  %s651_s21 = sld [smem:[#allocation5 + $0x6]]  ;;  %s203_s30 = scalar_lea.vmem [#allocation10], %s638_s23 }
  0x59   : > { %241 = vrot.lane.b32.xlu1 %v228_v22, %s879_s24  ;;  %v363_v56 = vstv %s654_s8  ;;  %v435_v59 = vstv %s660_s9  ;;  %p1252_p3 = scmp.ne.s32.totalorder %s1244_s25, 0  ;;  %s882_s9 = smov [#allocation10]  }
  0x5a   : > { %v369_v13 = vstv %s1119_s10  ;;  %s806_s10 = sshll.u32 %s882_s9, 4  ;;  %s807_s10 = int_to_ptr.vmem [resolvable:$false] %s806_s10 }
  0x5b   : > { %v275_v19 = vstv %s1122_s11  ;;  %s808_s11 = scalar_lea.vmem %s807_s10, 2048 }
  0xc5   : > { %v251_v23 = vpop.permute.xlu0 %250 }
  0xc6   : > { %256 = vst.msk [vmem:[#allocation3 + $0x1] sm:$0xff] %vm245_vm2, %v251_v23 }
  0xc7   : > { %v240_v24 = vpop.permute.xlu1 %239 }
  0xc8   : > { %246 = vst.msk [vmem:[#allocation2 + $0x1] sm:$0xff] %vm245_vm2, %v240_v24 }
  0xc9   : > { %v253_v25 = vpop.permute.xlu0 %252 }
  0xca   : > { %257 = vst.msk [vmem:[#allocation3 + $0x9] sm:$0xff] %vm245_vm2, %v253_v25 }
  0xcb   : > { %v242_v27 = vpop.permute.xlu1 %241 }
  0xcc   : > { %247 = vst.msk [vmem:[#allocation2 + $0x9] sm:$0xff] %vm245_vm2, %v242_v27  ;;  %v305_v27 = vstv %s1126_s13 }
  0xcd   : > { %v1085_v28 = vld [vmem:[#allocation3] sm:$0xff] }
  0xce   : > { %v376_v29 = vmul.f32 %v375_v26, %v1085_v28  ;;  %v389_v30 = vld [vmem:[#allocation3 + $0x1] sm:$0xff]  ;;  %v364_v58 = vmul.f32 %v363_v56, %v1085_v28  ;;  %v370_v20 = vmul.f32 %v369_v13, %v1085_v28 }
  0xcf   : > { %v406_v33 = vmul.f32 %v405_v31, %v389_v30  ;;  %v392_v42 = vmul.f32 %v391_v40, %v389_v30  ;;  %v1104_v45 = vld [vmem:[#allocation2 + $0x1] sm:$0xff]  ;;  %v420_v47 = vmul.f32 %v419_v44, %v389_v30  ;;  %v441_v30 = vstv %s1128_s28 }
  0xd0   : > { %380 = vrot.lane.b32.xlu0 %v376_v29, %s880_s29  ;;  %v292_v49 = vmul.f32 %v291_v46, %v1104_v45  ;;  %v320_v53 = vmul.f32 %v319_v50, %v1104_v45  ;;  %v1134_v18 = vld [vmem:[#allocation2] sm:$0xff] }
  0xd1   : > { %v1089_v32 = vld [vmem:[#allocation3 + $0x8] sm:$0xff] }
  0xd2   : > { %v377_v34 = vmul.f32 %v375_v26, %v1089_v32  ;;  %v1092_v35 = vld [vmem:[#allocation3 + $0x2] sm:$0xff]  ;;  %v1097_v41 = vld [vmem:[#allocation3 + $0xa] sm:$0xff]  ;;  %v365_v3 = vmul.f32 %v363_v56, %v1089_v32  ;;  %v276_v26 = vmul.f32 %v275_v19, %v1134_v18  ;;  %v371_v28 = vmul.f32 %v369_v13, %v1089_v32 }
  0xd3   : > { %v390_v37 = vld [vmem:[#allocation3 + $0x9] sm:$0xff]  ;;  %v448_v38 = vmul.f32 %v447_v36, %v1092_v35  ;;  %v449_v43 = vmul.f32 %v447_v36, %v1097_v41  ;;  %v1109_v51 = vld [vmem:[#allocation2 + $0x9] sm:$0xff]  ;;  %v436_v6 = vmul.f32 %v435_v59, %v1092_v35  ;;  %v437_v17 = vmul.f32 %v435_v59, %v1097_v41 }
  0xd4   : > { %410 = vrot.lane.b32.xlu0 %v406_v33, %s881_s4  ;;  %382 = vrot.lane.b32.xlu1 %v377_v34, %s880_s29  ;;  %v407_v39 = vmul.f32 %v405_v31, %v390_v37  ;;  %v393_v48 = vmul.f32 %v391_v40, %v390_v37  ;;  %v421_v52 = vmul.f32 %v419_v44, %v390_v37  ;;  %v262_v29 = vld [vmem:[#allocation2 + $0x8] sm:$0xff]  ;;  %v269_v36 = vstv %s1131_s6 }
  0xd5   : > { %v293_v54 = vmul.f32 %v291_v46, %v1109_v51  ;;  %v321_v55 = vmul.f32 %v319_v50, %v1109_v51  ;;  %v306_v34 = vmul.f32 %v305_v27, %v1104_v45  ;;  %v442_v40 = vmul.f32 %v441_v30, %v1092_v35 }
  0xd6   : > { %v270_v32 = vmul.f32 %v269_v36, %v1134_v18  ;;  %v443_v50 = vmul.f32 %v441_v30, %v1097_v41  ;;  %v271_v59 = vmul.f32 %v269_v36, %v262_v29 }
  0xd8   : > { %452 = vrot.lane.b32.xlu0 %v448_v38, %s880_s29  ;;  %412 = vrot.lane.b32.xlu1 %v407_v39, %s881_s4  ;;  %v277_v39 = vmul.f32 %v275_v19, %v262_v29 }
  0xdc   : > { %396 = vrot.lane.b32.xlu0 %v392_v42, %s879_s24  ;;  %454 = vrot.lane.b32.xlu1 %v449_v43, %s880_s29  ;;  %v333_v42 = vld [vmem:[#allocation2 + $0x2] sm:$0xff]  ;;  %v347_v43 = vstv %s1137_s27 }
  0xdd   : > { %v348_v45 = vmul.f32 %v347_v43, %v333_v42 }
  0xe0   : > { %424 = vrot.lane.b32.xlu0 %v420_v47, %s881_s4  ;;  %398 = vrot.lane.b32.xlu1 %v393_v48, %s879_s24 }
  0xe4   : > { %426 = vrot.lane.b32.xlu1 %v421_v52, %s881_s4  ;;  %296 = vrot.lane.b32.xlu0 %v292_v49, %s879_s24  ;;  %v307_v49 = vmul.f32 %v305_v27, %v1109_v51  ;;  %v341_v52 = vstv %s1143_s12 }
  0xe8   : > { %324 = vrot.lane.b32.xlu0 %v320_v53, %s881_s4  ;;  %298 = vrot.lane.b32.xlu1 %v293_v54, %s879_s24  ;;  %v334_v53 = vld [vmem:[#allocation2 + $0xa] sm:$0xff] }
  0xe9   : > { %v343_v41 = vmul.f32 %v341_v52, %v334_v53 }
  0xec   : > { %326 = vrot.lane.b32.xlu1 %v321_v55, %s881_s4 }
 0x142   : > { %v381_v57 = vpop.permute.xlu0 %380 }
 0x143   : > { %v386_v60 = vadd.f32 %v381_v57, %v364_v58  ;;  %v342_v58 = vmul.f32 %v341_v52, %v333_v42 }
 0x146   : > { %v411_v61 = vpop.permute.xlu0 %410  ;;  %v383_v62 = vpop.permute.xlu1 %382 }
 0x147   : > { %v416_v63 = vadd.f32 %v411_v61, %v386_v60  ;;  %v387_v7 = vadd.f32 %v383_v62, %v365_v3  ;;  %v349_v60 = vmul.f32 %v347_v43, %v334_v53 }
 0x149   : > { %v438_v9 = vadd.f32 %v436_v6, %v416_v63 }
 0x14a   : > { %v453_v11 = vpop.permute.xlu0 %452  ;;  %v413_v12 = vpop.permute.xlu1 %412 }
 0x14b   : > { %v458_v14 = vadd.f32 %v453_v11, %v438_v9  ;;  %v417_v16 = vadd.f32 %v413_v12, %v387_v7  ;;  %v259_v12 = vstv %s258_s20 }
 0x14d   : > { %472 = vrot.lane.b32.xlu0 %v458_v14, %s879_s24  ;;  %v439_v21 = vadd.f32 %v437_v17, %v417_v16 }
 0x14e   : > { %v397_v22 = vpop.permute.xlu0 %396  ;;  %v455_v23 = vpop.permute.xlu1 %454 }
 0x14f   : > { %v402_v24 = vadd.f32 %v397_v22, %v370_v20  ;;  %v459_v25 = vadd.f32 %v455_v23, %v439_v21  ;;  %v335_v20 = vstv %s651_s21 }
 0x151   : > { %280 = vrot.lane.b32.xlu0 %v276_v26, %s880_s29  ;;  %474 = vrot.lane.b32.xlu1 %v459_v25, %s879_s24  ;;  %s260_s24 = sld [smem:[#allocation5]]  ;;  %v336_v26 = vmul.f32 %v335_v20, %v333_v42 }
 0x152   : > { %v425_v31 = vpop.permute.xlu0 %424  ;;  %v399_v33 = vpop.permute.xlu1 %398 }
 0x153   : > { %v430_v37 = vadd.f32 %v425_v31, %v402_v24  ;;  %v403_v38 = vadd.f32 %v399_v33, %v371_v28  ;;  %v337_v31 = vmul.f32 %v335_v20, %v334_v53 }
 0x155   : > { %310 = vrot.lane.b32.xlu0 %v306_v34, %s881_s4  ;;  %282 = vrot.lane.b32.xlu1 %v277_v39, %s880_s29  ;;  %v444_v44 = vadd.f32 %v442_v40, %v430_v37 }
 0x156   : > { %v297_v46 = vpop.permute.xlu0 %296  ;;  %v427_v47 = vpop.permute.xlu1 %426 }
 0x157   : > { %v431_v48 = vadd.f32 %v427_v47, %v403_v38  ;;  %v302_v35 = vadd.f32 %v297_v46, %v270_v32  ;;  %v263_v6 = vstv %s260_s24 }
 0x158   : > { %v264_v11 = vmul.f32 %v263_v6, %v1134_v18  ;;  %v265_v19 = vmul.f32 %v263_v6, %v262_v29 }
 0x159   : > { %352 = vrot.lane.b32.xlu0 %v348_v45, %s880_s29  ;;  %312 = vrot.lane.b32.xlu1 %v307_v49, %s881_s4  ;;  %v445_v54 = vadd.f32 %v443_v50, %v431_v48 }
 0x15a   : > { %v325_v55 = vpop.permute.xlu0 %324  ;;  %v299_v56 = vpop.permute.xlu1 %298  ;;  %v266_v16 = vadd.f32 %v264_v11, %v259_v12  ;;  %v267_v25 = vadd.f32 %v265_v19, %v259_v12 }
 0x15b   : > { %v330_v57 = vadd.f32 %v325_v55, %v302_v35  ;;  %v303_v62 = vadd.f32 %v299_v56, %v271_v59 }
 0x15d   : > { %v344_v61 = vadd.f32 %v342_v58, %v330_v57  ;;  %354 = vrot.lane.b32.xlu1 %v349_v60, %s880_s29  ;;  %s683_s29 = sshll.u32 %s929_s1, 10  ;;  %s531_s1 = scalar_lea.sflag [#allocation7], %s1039_s18 }
 0x15e   : > { %v327_v51 = vpop.permute.xlu1 %326  ;;  %s1181_s8 = scalar_lea.hbm %s1238_s3, %s683_s29 }
 0x15f   : > { %v331_v63 = vadd.f32 %v327_v51, %v303_v62  ;;  %462 = vrot.lane.b32.xlu0 %v344_v61, %s881_s4 }
 0x161   : > { %v345_v3 = vadd.f32 %v343_v41, %v331_v63 }
 0x163   : > { %464 = vrot.lane.b32.xlu1 %v345_v3, %s881_s4 }
 0x1bf   : > { %v473_v7 = vpop.permute.xlu0 %472 }
 0x1c0   : > { %v478_v9 = vadd.f32 %v473_v7, %v444_v44 }
 0x1c2   : > { %482 = vrot.lane.b32.xlu0 %v478_v9, %s881_s4 }
 0x1c3   : > { %v281_v13 = vpop.permute.xlu0 %280  ;;  %v475_v14 = vpop.permute.xlu1 %474 }
 0x1c4   : > { %v479_v17 = vadd.f32 %v475_v14, %v445_v54  ;;  %v286_v21 = vadd.f32 %v281_v13, %v266_v16 }
 0x1c6   : > { %484 = vrot.lane.b32.xlu1 %v479_v17, %s881_s4  ;;  %s544_s4 = sshll.u32 %s203_s30, 4  ;;  %s1183_s4 = int_to_ptr.vmem [resolvable:$true] %s544_s4 }
 0x1c7   : > { %v311_v22 = vpop.permute.xlu0 %310  ;;  %v283_v23 = vpop.permute.xlu1 %282  ;;  %s802_s23 = scalar_lea.vmem %s1183_s4, 1024  ;;  %p809_p10 = scmp.lt.s32.totalorder %s1183_s4, %s807_s10 }
 0x1c8   : > { %v316_v24 = vadd.f32 %v311_v22, %v286_v21  ;;  %v287_v27 = vadd.f32 %v283_v23, %v267_v25  ;;  %p803_p13 = scmp.ne.s32.totalorder %s1183_s4, %s802_s23  ;;  %p810_p1 = scmp.lt.s32.totalorder %s808_s11, %s802_s23 }
 0x1ca   : > { %v338_v30 = vadd.f32 %v336_v26, %v316_v24  ;;  %p804_p8 = pnand %p803_p13, %p1252_p3  ;;  %p811_p4 = por %p810_p1, %p809_p10 }
 0x1cb   : > { %v313_v18 = vpop.permute.xlu1 %312  ;;  %v353_v34 = vpop.permute.xlu0 %352 }
 0x1cc   : > { %v317_v28 = vadd.f32 %v313_v18, %v287_v27  ;;  %v358_v38 = vadd.f32 %v353_v34, %v338_v30  ;;  %p805_p9 = pneg %p804_p8 }
 0x1ce   : > { %v339_v33 = vadd.f32 %v337_v31, %v317_v28  ;;  %p812_p11 = pnand %p811_p4, %p805_p9 }
 0x1cf   : > { %v355_v36 = vpop.permute.xlu1 %354 }
 0x1d0   : > { %v359_v43 = vadd.f32 %v355_v36, %v339_v33 }
 0x1d1   : > { %v463_v37 = vpop.permute.xlu0 %462 }
 0x1d2   : > { %v468_v29 = vadd.f32 %v463_v37, %v358_v38 }
 0x1d5   : > { %v465_v39 = vpop.permute.xlu1 %464 }
 0x1d6   : > { %v469_v46 = vadd.f32 %v465_v39, %v359_v43 }
 0x234   : > { %v483_v40 = vpop.permute.xlu0 %482 }
 0x235   : > { %v488_v44 = vadd.f32 %v483_v40, %v468_v29 }
 0x237   : > { %v663_v32 = vmul.f32 -1.442695, %v488_v44 }
 0x238   : > { %v485_v47 = vpop.permute.xlu1 %484 }
 0x239   : > { %749 = vpow2.f32 %v663_v32  ;;  %v489_v42 = vadd.f32 %v485_v47, %v469_v46 }
 0x23b   : > { %v664_v48 = vmul.f32 -1.442695, %v489_v42 }
 0x23d   : > { %751 = vpow2.f32 %v664_v48 }
 0x243   : > { %v750_v45 = vpop.eup %749 }
 0x244   : > { %v496_v49 = vadd.f32 1.0, %v750_v45 }
 0x246   : > { %753 = vrcp.f32 %v496_v49 }
 0x247   : > { %v752_v50 = vpop.eup %751 }
 0x248   : > { %v497_v52 = vadd.f32 1.0, %v752_v50 }
 0x24a   : > { %755 = vrcp.f32 %v497_v52 }
 0x250   : > { %v754_v53 = vpop.eup %753 }
 0x251   : > { %v504_v35 = vmul.f32 %v754_v53, %v1049_v0  ;;  %v511_v54 = vmul.f32 %v754_v53, %v1051_v1  ;;  %v518_v55 = vmul.f32 %v754_v53, %v1053_v2  ;;  %v525_v56 = vmul.f32 %v754_v53, %v1063_v8 }
 0x253   : > { %507 = vst.msk [vmem:[%s203_s30] sm:$0xff] %vm506_vm3, %v504_v35  ;;  %667 = vst.msk [vmem:[%s203_s30 + $0x10] sm:$0xff] %vm506_vm3, %v511_v54 }
 0x254   : > { %671 = vst.msk [vmem:[%s203_s30 + $0x20] sm:$0xff] %vm506_vm3, %v518_v55  ;;  %675 = vst.msk [vmem:[%s203_s30 + $0x30] sm:$0xff] %vm506_vm3, %v525_v56  ;;  %v756_v0 = vpop.eup %755 }
 0x255   : > { %v505_v1 = vmul.f32 %v756_v0, %v1057_v4  ;;  %v512_v2 = vmul.f32 %v756_v0, %v1059_v5  ;;  %v519_v8 = vmul.f32 %v756_v0, %v1067_v10  ;;  %v526_v57 = vmul.f32 %v756_v0, %v1074_v15 }
 0x257   : > { %508 = vst.msk [vmem:[%s203_s30 + $0x8] sm:$0xff] %vm506_vm3, %v505_v1  ;;  %668 = vst.msk [vmem:[%s203_s30 + $0x18] sm:$0xff] %vm506_vm3, %v512_v2 }
 0x258   : > { %672 = vst.msk [vmem:[%s203_s30 + $0x28] sm:$0xff] %vm506_vm3, %v519_v8  ;;  %676 = vst.msk [vmem:[%s203_s30 + $0x38] sm:$0xff] %vm506_vm3, %v526_v57 }
 0x259   : > { %815 = shalt.err (!%p812_p11)
}
 0x25a   : > { %s816_s13 = scalar_lea.hbm %s1181_s8, 1024  ;;  %s820_s27 = scalar_lea.hbm %s1238_s3, 2048 }
 0x25b   : > { %p817_p0 = scmp.ne.s32.totalorder %s1181_s8, %s816_s13  ;;  %p821_p5 = scmp.lt.u32.totalorder %s1181_s8, %s1238_s3 }
 0x25c   : > { %p822_p12 = scmp.lt.u32.totalorder %s820_s27, %s816_s13  ;;  %p824_p13 = scmp.lt.u32.totalorder %s816_s13, %s1181_s8 }
 0x25d   : > { %p818_p2 = pnand %p817_p0, %p1252_p3 }
 0x25e   : > { %p823_p6 = por %p822_p12, %p821_p5 }
 0x25f   : > { %p819_p7 = pneg %p818_p2 }
 0x260   : > { %p825_p8 = por %p824_p13, %p823_p6 }
 0x262   : > { %p826_p9 = pnand %p825_p8, %p819_p7 }
 0x264   : > { %829 = shalt.err (!%p826_p9)
}
 0x265   : > { %s883_s20 = smov 128   ;;  %s884_s21 = smov 8  }
 0x266   : > { %690 = dma.vmem_to_hbm [thread:$0]  (%p1252_p3), %s1183_s4, 1024, %s1181_s8, %s531_s1, %s883_s20, %s883_s20, %s884_s21  }
 0x267 PF: > { %s559_s29 = sand.u32 1, %s860_s14   ;;  %p1253_p10 = scmp.ne.s32.totalorder %s1245_s26, 0 }
 0x268   : > { %p1254_p1 = scmp.ge.s32.totalorder %s872_s17, 2  ;;  %s560_s30 = scalar_lea.sflag [#allocation7], %s559_s29 }
 0x26a   : > { %p701_p4 = pnand %p1254_p1, %p1253_p10 }
 0x26c   : > { %855 = dma.done.wait (!%p701_p4), %s560_s30, 1024  }
 0x26d   : > { %857 = vsyncadd (!%p701_p4), %s560_s30, 4294966272  ;;  %p18_p11 = scmp.ge.s32.totalorder %s933_s19, 4   ;;  %s1255_s14 = smov %s864_s15 }
 0x26e   : > { %s1256_s15 = smov %s868_s16  ;;  %s1257_s16 = smov %s945_s22 }
 0x26f   : > { %s1258_s17 = smov %s933_s19  ;;  %20 = sbr.rel (!%p18_p11) target bundleno = 8 (0x8), region = 88 }
 0x276   :  { %565 = vsyncpa [#allocation6], 1 }
 0x277   :  { %567 = vsyncpa [#allocation6 + $0x1], 1 }
 0x278   :  { %568 = vsyncpa [#allocation7], 1 }
 0x279   :  { %570 = vsyncpa [#allocation7 + $0x1], 1 }
 0x27a   :  { %571 = vsyncpa [#allocation8], 1 }
 0x27b   :  { %573 = vsyncpa [#allocation8 + $0x1], 1 }

</bundles_post_ra>
